<compile_context>
chip_gen: v5e
topology: v5e:2x2
jax: 0.10.0
libtpu: 0.0.40
codegen_flags: <defaults>
</compile_context>

<pallas_src>
import functools

import jax
import jax.numpy as jnp
from jax import lax
from jax.experimental import pallas as pl
from jax.experimental.pallas import tpu as pltpu

n_embd = 32
hidden_dim = 128
dropout = 0.2

_PACK = 4                                   # tokens per 128-lane slab row (128 // 32)
_KEEP_PROB = 1.0 - dropout
_KEEP_THR_23 = int(round(_KEEP_PROB * (1 << 23)))   # integer dropout threshold


def _round_up(x, m):
    return ((x + m - 1) // m) * m


def _ffn_kernel(seed_ref, x_ref, w1_ref, b1_ref, w2_ref, b2_ref, o_ref, *,
                training, use_hw_prng):
    # x_ref: (tm4, 128) slab = 4 tokens per row. Both matmuls run on the MXU
    # with f32 accumulation against resident block-diagonal (lane-dense) weights.
    h = jnp.dot(x_ref[...], w1_ref[...], preferred_element_type=jnp.float32)
    h = jnp.maximum(h + b1_ref[...], 0.0)                        # bias + ReLU
    y = jnp.dot(h, w2_ref[...], preferred_element_type=jnp.float32)
    y = y + b2_ref[...]

    if training:
        # Inverted dropout. 1/(1-p) is already folded into w2/b2 wrapper-side,
        # so only a keep/zero select remains (integer compare on 23 uniform bits).
        if use_hw_prng:
            pltpu.prng_seed(seed_ref[0], pl.program_id(0))
            bits = pltpu.prng_random_bits(y.shape)
        else:
            # Stateless add/shift/xor hash -- interpret/CPU fallback only.
            # Indices mixed in uint32; collisions only past 2**25 slab rows
            # (~134M tokens), irrelevant here.
            tm4 = y.shape[0]
            row0 = pl.program_id(0) * tm4
            rows = lax.broadcasted_iota(jnp.uint32, y.shape, 0) + jnp.uint32(row0)
            cols = lax.broadcasted_iota(jnp.uint32, y.shape, 1)
            z = (rows << 7) + cols + seed_ref[0].astype(jnp.uint32)
            z = z + jnp.uint32(0x9E3779B9)
            z = z + (z << 10)
            z = z ^ (z >> 6)
            z = z + (z << 3)
            z = z ^ (z >> 11)
            z = z + (z << 15)
            z = z ^ (z >> 7)
            bits = z
        keep = (bits & 0x7FFFFF) < _KEEP_THR_23
        y = jnp.where(keep, y, 0.0)

    o_ref[...] = y.astype(o_ref.dtype)


def feed_forward(x, w1, b1, w2, b2, *, training=False, seed=0,
                 tile_tokens=4096, use_hw_prng=None):
    """x: (B, T, n_embd) float32 -> (B, T, n_embd).

    Matches nn.Sequential(Linear(32,128), ReLU, Linear(128,32), Dropout(0.2)).
    """
    B, T, C = x.shape
    assert C == n_embd
    if use_hw_prng is None:
        use_hw_prng = jax.default_backend() == "tpu"

    M = B * T
    x2d = x.reshape(M, C)

    # Pack 4 tokens per 128-lane row. For typical shapes M % 4 == 0 and the
    # reshape is a free view of the contiguous (M, 32) buffer.
    M_r = _round_up(M, _PACK)
    if M_r != M:
        x2d = jnp.pad(x2d, ((0, M_r - M), (0, 0)))
    M4 = M_r // _PACK
    x_slab = x2d.reshape(M4, _PACK * C)                          # (M/4, 128)

    # Block-diagonal weights (4 independent copies along the diagonal) so the
    # packed tokens never mix; biases tiled to match. Built once (~0.5 MiB).
    w1_blk = jax.scipy.linalg.block_diag(*([w1] * _PACK))        # (128, 512)
    w2_blk = jax.scipy.linalg.block_diag(*([w2] * _PACK))        # (512, 128)
    b1_blk = jnp.tile(b1.reshape(1, hidden_dim), (1, _PACK))     # (1, 512)
    b2_blk = jnp.tile(b2.reshape(1, C), (1, _PACK))              # (1, 128)
    if training:
        inv_keep = 1.0 / _KEEP_PROB
        w2_blk = w2_blk * inv_keep                               # fold dropout scale
        b2_blk = b2_blk * inv_keep                               # into the 2nd linear

    # Row tile (in slab rows): large to amortize per-grid-step overhead, a
    # multiple of 8 sublanes, and capped near half the rows so the "parallel"
    # grid has >= 2 steps (v7x megacore). Ragged last block is masked by Pallas.
    tm4_max = max(8, _round_up(tile_tokens // _PACK, 8))
    if M4 <= 8:
        tm4 = M4                                                 # tiny input: one full block
    else:
        tm4 = min(tm4_max, _round_up((M4 + 1) // 2, 8))
    grid = (pl.cdiv(M4, tm4),)

    HB = _PACK * hidden_dim                                      # 512
    CB = _PACK * C                                               # 128
    seed_arr = jnp.array([seed], dtype=jnp.int32)

    grid_spec = pltpu.PrefetchScalarGridSpec(
        num_scalar_prefetch=1,
        grid=grid,
        in_specs=[
            pl.BlockSpec((tm4, CB), lambda i, s: (i, 0)),        # x slab rows
            pl.BlockSpec((CB, HB), lambda i, s: (0, 0)),         # w1 block-diag (resident)
            pl.BlockSpec((1, HB), lambda i, s: (0, 0)),          # b1
            pl.BlockSpec((HB, CB), lambda i, s: (0, 0)),         # w2 block-diag (resident)
            pl.BlockSpec((1, CB), lambda i, s: (0, 0)),          # b2
        ],
        out_specs=pl.BlockSpec((tm4, CB), lambda i, s: (i, 0)),
    )

    bytes_per = jnp.dtype(x.dtype).itemsize
    cost = pl.CostEstimate(
        flops=4 * M4 * CB * HB,                                  # two MXU matmuls
        transcendentals=0,
        bytes_accessed=(2 * M4 * CB + CB * HB + HB + HB * CB + CB) * bytes_per,
    )

    out_slab = pl.pallas_call(
        functools.partial(_ffn_kernel, training=training, use_hw_prng=use_hw_prng),
        out_shape=jax.ShapeDtypeStruct((M4, CB), x.dtype),
        grid_spec=grid_spec,
        compiler_params=pltpu.CompilerParams(
            dimension_semantics=("parallel",)),
        cost_estimate=cost,
    )(seed_arr, x_slab, w1_blk, b1_blk, w2_blk, b2_blk)

    out2d = out_slab.reshape(M_r, C)
    if M_r != M:
        out2d = out2d[:M]
    return out2d.reshape(B, T, C)


def _init_params(key):
    """Deterministic init mimicking PyTorch's default Linear init (U(-k, k))."""
    k1, k2, k3, k4 = jax.random.split(key, 4)
    bound1 = 1.0 / (n_embd ** 0.5)
    bound2 = 1.0 / (hidden_dim ** 0.5)
    w1 = jax.random.uniform(k1, (n_embd, hidden_dim), jnp.float32, -bound1, bound1)
    b1 = jax.random.uniform(k2, (hidden_dim,), jnp.float32, -bound1, bound1)
    w2 = jax.random.uniform(k3, (hidden_dim, n_embd), jnp.float32, -bound2, bound2)
    b2 = jax.random.uniform(k4, (n_embd,), jnp.float32, -bound2, bound2)
    return w1, b1, w2, b2


if __name__ == "__main__":
    key = jax.random.PRNGKey(0)
    pkey, xkey = jax.random.split(key)
    w1, b1, w2, b2 = _init_params(pkey)

    B, T = 2, 8
    x = jax.random.normal(xkey, (B, T, n_embd), dtype=jnp.float32)

    # Eval-mode forward (dropout is identity), matching model.eval() in PyTorch.
    out = jax.block_until_ready(feed_forward(x, w1, b1, w2, b2, training=False))

    # Pure-JAX reference (eval mode).
    ref = jnp.maximum(x.reshape(-1, n_embd) @ w1 + b1, 0.0) @ w2 + b2
    ref = ref.reshape(B, T, n_embd)
    assert jnp.allclose(out, ref, atol=1e-4, rtol=1e-4), "mismatch vs reference"

    # Train-mode: every element is either dropped (0) or the eval value / (1-p).
    out_train = jax.block_until_ready(
        feed_forward(x, w1, b1, w2, b2, training=True, seed=123))
    assert out_train.shape == out.shape
    scaled = out / (1.0 - dropout)
    dropped = out_train == 0.0
    ok = dropped | (jnp.abs(out_train - scaled) < 1e-4)
    assert bool(jnp.all(ok)), "dropout output is not {0, y/(1-p)}"
    frac = float(jnp.mean(dropped.astype(jnp.float32)))
    assert 0.01 < frac < 0.6, f"implausible dropout rate {frac}"

    print("KERNEL_OK")
</pallas_src>

<mosaic_0001>
module attributes {stable_mosaic.version = 11 : i64} {
  func.func @_ffn_kernel(%arg0: i32, %arg1: memref<1xi32, #tpu.memory_space<smem>>, %arg2: memref<4x128xf32, #tpu.memory_space<vmem>>, %arg3: memref<128x512xf32, #tpu.memory_space<vmem>>, %arg4: memref<1x512xf32, #tpu.memory_space<vmem>>, %arg5: memref<512x128xf32, #tpu.memory_space<vmem>>, %arg6: memref<1x128xf32, #tpu.memory_space<vmem>>, %arg7: memref<4x128xf32, #tpu.memory_space<vmem>>) attributes {dimension_semantics = [#tpu.dimension_semantics<parallel>], iteration_bounds = array<i64: 1>, scalar_prefetch = 1 : i64, scratch_operands = 0 : i64, tpu.core_type = #tpu.core_type<tc>, window_params = [{transform_indices = @transform_0, window_bounds = array<i64: 4, 128>}, {pipeline_mode = #tpu.pipeline_mode<synchronous>, transform_indices = @transform_1, window_bounds = array<i64: 128, 512>}, {pipeline_mode = #tpu.pipeline_mode<synchronous>, transform_indices = @transform_2, window_bounds = array<i64: 1, 512>}, {pipeline_mode = #tpu.pipeline_mode<synchronous>, transform_indices = @transform_3, window_bounds = array<i64: 512, 128>}, {pipeline_mode = #tpu.pipeline_mode<synchronous>, transform_indices = @transform_4, window_bounds = array<i64: 1, 128>}, {transform_indices = @transform_5, window_bounds = array<i64: 4, 128>}]} {
    %c0 = arith.constant 0 : index
    %c0_0 = arith.constant 0 : index
    %0 = vector.load %arg2[%c0, %c0_0] : memref<4x128xf32, #tpu.memory_space<vmem>>, vector<4x128xf32>
    %c0_1 = arith.constant 0 : index
    %c0_2 = arith.constant 0 : index
    %1 = vector.load %arg3[%c0_1, %c0_2] : memref<128x512xf32, #tpu.memory_space<vmem>>, vector<128x512xf32>
    %cst = arith.constant dense<0.000000e+00> : vector<4x512xf32>
    %2 = tpu.matmul %0, %1, %cst {dimension_numbers = #tpu.dot_dimension_numbers<[1], [0], [0], [1], [0, 0, 1, 1], [], []>} : vector<4x128xf32>, vector<128x512xf32>, vector<4x512xf32> -> vector<4x512xf32>
    %c0_3 = arith.constant 0 : index
    %c0_4 = arith.constant 0 : index
    %3 = vector.load %arg4[%c0_3, %c0_4] : memref<1x512xf32, #tpu.memory_space<vmem>>, vector<1x512xf32>
    %4 = vector.broadcast %3 : vector<1x512xf32> to vector<4x512xf32>
    %5 = arith.addf %2, %4 : vector<4x512xf32>
    %cst_5 = arith.constant 0.000000e+00 : f32
    %6 = vector.broadcast %cst_5 : f32 to vector<4x512xf32>
    %7 = arith.maximumf %5, %6 : vector<4x512xf32>
    %c0_6 = arith.constant 0 : index
    %c0_7 = arith.constant 0 : index
    %8 = vector.load %arg5[%c0_6, %c0_7] : memref<512x128xf32, #tpu.memory_space<vmem>>, vector<512x128xf32>
    %cst_8 = arith.constant dense<0.000000e+00> : vector<4x128xf32>
    %9 = tpu.matmul %7, %8, %cst_8 {dimension_numbers = #tpu.dot_dimension_numbers<[1], [0], [0], [1], [0, 0, 1, 1], [], []>} : vector<4x512xf32>, vector<512x128xf32>, vector<4x128xf32> -> vector<4x128xf32>
    %c0_9 = arith.constant 0 : index
    %c0_10 = arith.constant 0 : index
    %10 = vector.load %arg6[%c0_9, %c0_10] : memref<1x128xf32, #tpu.memory_space<vmem>>, vector<1x128xf32>
    %11 = vector.broadcast %10 : vector<1x128xf32> to vector<4x128xf32>
    %12 = arith.addf %9, %11 : vector<4x128xf32>
    %c0_11 = arith.constant 0 : index
    %c0_12 = arith.constant 0 : index
    %13 = vector.load %arg7[%c0_11, %c0_12] : memref<4x128xf32, #tpu.memory_space<vmem>>, vector<4x128xf32>
    tpu.vector_store %arg7[%c0_11, %c0_12], %12 {strides = array<i32>} : memref<4x128xf32, #tpu.memory_space<vmem>>, vector<4x128xf32>,
    return
  }
  func.func @transform_0(%arg0: i32, %arg1: memref<1xi32, #tpu.memory_space<smem>>) -> (i32, i32) {
    %c0_i32 = arith.constant 0 : i32
    %c0_i32_0 = arith.constant 0 : i32
    return %arg0, %c0_i32 : i32, i32
  }
  func.func @transform_1(%arg0: i32, %arg1: memref<1xi32, #tpu.memory_space<smem>>) -> (i32, i32) {
    %c0_i32 = arith.constant 0 : i32
    %c0_i32_0 = arith.constant 0 : i32
    %c0_i32_1 = arith.constant 0 : i32
    return %c0_i32, %c0_i32_0 : i32, i32
  }
  func.func @transform_2(%arg0: i32, %arg1: memref<1xi32, #tpu.memory_space<smem>>) -> (i32, i32) {
    %c0_i32 = arith.constant 0 : i32
    %c0_i32_0 = arith.constant 0 : i32
    %c0_i32_1 = arith.constant 0 : i32
    return %c0_i32, %c0_i32_0 : i32, i32
  }
  func.func @transform_3(%arg0: i32, %arg1: memref<1xi32, #tpu.memory_space<smem>>) -> (i32, i32) {
    %c0_i32 = arith.constant 0 : i32
    %c0_i32_0 = arith.constant 0 : i32
    %c0_i32_1 = arith.constant 0 : i32
    return %c0_i32, %c0_i32_0 : i32, i32
  }
  func.func @transform_4(%arg0: i32, %arg1: memref<1xi32, #tpu.memory_space<smem>>) -> (i32, i32) {
    %c0_i32 = arith.constant 0 : i32
    %c0_i32_0 = arith.constant 0 : i32
    %c0_i32_1 = arith.constant 0 : i32
    return %c0_i32, %c0_i32_0 : i32, i32
  }
  func.func @transform_5(%arg0: i32, %arg1: memref<1xi32, #tpu.memory_space<smem>>) -> (i32, i32) {
    %c0_i32 = arith.constant 0 : i32
    %c0_i32_0 = arith.constant 0 : i32
    return %arg0, %c0_i32 : i32, i32
  }
}

</mosaic_0001>

<bundles_post_ra>
// kernel: tpu_custom_call.1
= control target key start
LH: loop header
LB: loop body
LE: loop exit
PB: predicated region body
PF: predicated region fallthrough
CT: control target
= control target key end

     0   :  { %12 = vsyncpa [#allocation5], 0  ;;  %s609_s0 = inlined_call_operand.<no memory space> [shape: s32[1], index: 0, kind: input, shape index: {}]   ;;  %s610_s1 = inlined_call_operand.hbm [shape: f32[4,128], index: 1, kind: input, shape index: {}]   ;;  %s611_s2 = inlined_call_operand.hbm [shape: f32[128,512], index: 2, kind: input, shape index: {}]   ;;  %s612_s3 = inlined_call_operand.hbm [shape: f32[1,512], index: 3, kind: input, shape index: {}]   ;;  %s613_s4 = inlined_call_operand.hbm [shape: f32[512,128], index: 4, kind: input, shape index: {}]   ;;  %s614_s5 = inlined_call_operand.vmem [shape: f32[1,128], index: 5, kind: input, shape index: {}]   ;;  %s615_s6 = inlined_call_operand.hbm [shape: f32[4,128], index: 6, kind: output, shape index: {}]  }
   0x1   :  { %13 = vsyncpa [#allocation8], 0 }
   0x2   :  { %14 = vsyncpa [#allocation11], 0  ;;  %s31_s22 = sshll.u32 %s611_s2, 4  ;;  %s32_s22 = int_to_ptr.hbm [resolvable:$true] %s31_s22 }
   0x3   :  { %15 = vsyncpa [#allocation6], 0  ;;  %s547_s23 = smov [#allocation7]   ;;  %s21_s27 = sshll.u32 %s610_s1, 4  ;;  %s22_s27 = int_to_ptr.hbm [resolvable:$true] %s21_s27 }
   0x4   :  { %s33_s24 = sshll.u32 %s547_s23, 4  ;;  %s548_s28 = smov 512   ;;  %s34_s24 = int_to_ptr.vmem [resolvable:$true] %s33_s24 }
   0x5   :  { %s549_s29 = smov 32   ;;  %s550_s30 = smov [#allocation4]  }
   0x6   :  { %39 = dma.hbm_to_vmem [thread:$0]  %s32_s22, 8192, %s34_s24, [#allocation8], %s548_s28, %s548_s28, %s549_s29  }
   0x7   :  { %s23_s7 = sshll.u32 %s550_s30, 4  ;;  %s45_s10 = sshll.u32 %s612_s3, 4  ;;  %s24_s7 = int_to_ptr.vmem [resolvable:$true] %s23_s7  ;;  %s46_s10 = int_to_ptr.hbm [resolvable:$true] %s45_s10 }
   0x8   :  { %26 = dma.hbm_to_vmem [thread:$0]  %s22_s27, 64, %s24_s7, [#allocation5]  }
   0x9   :  { %s55_s12 = sshll.u32 %s613_s4, 4  ;;  %s551_s13 = smov [#allocation9]   ;;  %s56_s12 = int_to_ptr.hbm [resolvable:$true] %s55_s12 }
   0xa   :  { %s47_s14 = sshll.u32 %s551_s13, 4  ;;  %s552_s1 = smov [#allocation10]   ;;  %s48_s14 = int_to_ptr.vmem [resolvable:$true] %s47_s14 }
   0xb   :  { %50 = dma.hbm_to_vmem [thread:$0]  %s46_s10, 64, %s48_s14, [#allocation8]  }
   0xc   :  { %s57_s15 = sshll.u32 %s552_s1, 4  ;;  %s553_s16 = smov 128   ;;  %s58_s15 = int_to_ptr.vmem [resolvable:$true] %s57_s15 }
   0xd   :  { %s554_s17 = smov 8  }
   0xe   :  { %63 = dma.hbm_to_vmem [thread:$0]  %s56_s12, 8192, %s58_s15, [#allocation11], %s553_s16, %s553_s16, %s554_s17  }
   0xf   :  { %539 = dma.done.wait [#allocation5], 64  }
  0x10   :  { %540 = vsyncadd [#allocation5], 4294967232 }
  0x11   :  { %541 = dma.done.wait [#allocation8], 8256  }
  0x12   :  { %542 = vsyncadd [#allocation8], 4294959040 }
  0x13   :  { %543 = dma.done.wait [#allocation11], 8192  }
  0x14   :  { %544 = vsyncadd [#allocation11], 4294959104  ;;  %v145_v0 = vld [vmem:[#allocation7 + $0x1f0] sm:$0xff]  ;;  %v146_v2 = vld [vmem:[#allocation7 + $0x1f8] sm:$0xff]  ;;  %s555_s18 = smov [#allocation12]   ;;  %s397_s21 = sshll.u32 %s615_s6, 4  ;;  %s398_s21 = int_to_ptr.hbm [resolvable:$true] %s397_s21 }
  0x15   :  { %v141_v1 = vld [vmem:[#allocation7 + $0x1d0] sm:$0xff]  ;;  %197 = vmatpush.msra.mxu2 %v145_v0  ;;  %217 = vmatpush.msra.mxu3 %v146_v2  ;;  %v142_v3 = vld [vmem:[#allocation7 + $0x1d8] sm:$0xff]  ;;  %v143_v6 = vld [vmem:[#allocation7 + $0x1e0] sm:$0xff]  ;;  %s395_s19 = sshll.u32 %s555_s18, 4  ;;  %s396_s19 = int_to_ptr.vmem [resolvable:$true] %s395_s19 }
  0x16   :  { %v137_v4 = vld [vmem:[#allocation7 + $0x1b0] sm:$0xff]  ;;  %v138_v5 = vld [vmem:[#allocation7 + $0x1b8] sm:$0xff]  ;;  %v139_v7 = vld [vmem:[#allocation7 + $0x1c0] sm:$0xff]  ;;  %157 = vmatpush.msra.mxu0 %v143_v6 }
  0x17   :  { %198 = vmatpush.msra.mxu2 %v141_v1  ;;  %218 = vmatpush.msra.mxu3 %v142_v3  ;;  %v144_v8 = vld [vmem:[#allocation7 + $0x1e8] sm:$0xff]  ;;  %v133_v9 = vld [vmem:[#allocation7 + $0x190] sm:$0xff]  ;;  %v134_v10 = vld [vmem:[#allocation7 + $0x198] sm:$0xff] }
  0x18   :  { %177 = vmatpush.msra.mxu1 %v144_v8  ;;  %v135_v11 = vld [vmem:[#allocation7 + $0x1a0] sm:$0xff]  ;;  %v140_v12 = vld [vmem:[#allocation7 + $0x1c8] sm:$0xff]  ;;  %v129_v13 = vld [vmem:[#allocation7 + $0x170] sm:$0xff]  ;;  %158 = vmatpush.msra.mxu0 %v139_v7 }
  0x19   :  { %199 = vmatpush.msra.mxu2 %v137_v4  ;;  %219 = vmatpush.msra.mxu3 %v138_v5  ;;  %v130_v14 = vld [vmem:[#allocation7 + $0x178] sm:$0xff]  ;;  %v136_v15 = vld [vmem:[#allocation7 + $0x1a8] sm:$0xff]  ;;  %v131_v16 = vld [vmem:[#allocation7 + $0x180] sm:$0xff] }
  0x1a   :  { %178 = vmatpush.msra.mxu1 %v140_v12  ;;  %v132_v17 = vld [vmem:[#allocation7 + $0x188] sm:$0xff]  ;;  %v125_v18 = vld [vmem:[#allocation7 + $0x150] sm:$0xff]  ;;  %159 = vmatpush.msra.mxu0 %v135_v11  ;;  %v126_v19 = vld [vmem:[#allocation7 + $0x158] sm:$0xff] }
  0x1b   :  { %200 = vmatpush.msra.mxu2 %v133_v9  ;;  %220 = vmatpush.msra.mxu3 %v134_v10  ;;  %v127_v20 = vld [vmem:[#allocation7 + $0x160] sm:$0xff]  ;;  %v128_v21 = vld [vmem:[#allocation7 + $0x168] sm:$0xff]  ;;  %v121_v22 = vld [vmem:[#allocation7 + $0x130] sm:$0xff] }
  0x1c   :  { %179 = vmatpush.msra.mxu1 %v136_v15  ;;  %160 = vmatpush.msra.mxu0 %v131_v16  ;;  %v122_v23 = vld [vmem:[#allocation7 + $0x138] sm:$0xff]  ;;  %v123_v24 = vld [vmem:[#allocation7 + $0x140] sm:$0xff]  ;;  %v124_v25 = vld [vmem:[#allocation7 + $0x148] sm:$0xff] }
  0x1d   :  { %201 = vmatpush.msra.mxu2 %v129_v13  ;;  %221 = vmatpush.msra.mxu3 %v130_v14  ;;  %v117_v26 = vld [vmem:[#allocation7 + $0x110] sm:$0xff]  ;;  %v118_v27 = vld [vmem:[#allocation7 + $0x118] sm:$0xff]  ;;  %v119_v28 = vld [vmem:[#allocation7 + $0x120] sm:$0xff] }
  0x1e   :  { %180 = vmatpush.msra.mxu1 %v132_v17  ;;  %161 = vmatpush.msra.mxu0 %v127_v20  ;;  %v120_v29 = vld [vmem:[#allocation7 + $0x128] sm:$0xff]  ;;  %v113_v30 = vld [vmem:[#allocation7 + $0xf0] sm:$0xff]  ;;  %v114_v31 = vld [vmem:[#allocation7 + $0xf8] sm:$0xff] }
  0x1f   :  { %202 = vmatpush.msra.mxu2 %v125_v18  ;;  %222 = vmatpush.msra.mxu3 %v126_v19  ;;  %v115_v32 = vld [vmem:[#allocation7 + $0x100] sm:$0xff]  ;;  %v116_v33 = vld [vmem:[#allocation7 + $0x108] sm:$0xff]  ;;  %v109_v34 = vld [vmem:[#allocation7 + $0xd0] sm:$0xff] }
  0x20   :  { %181 = vmatpush.msra.mxu1 %v128_v21  ;;  %162 = vmatpush.msra.mxu0 %v123_v24  ;;  %v110_v35 = vld [vmem:[#allocation7 + $0xd8] sm:$0xff]  ;;  %v111_v36 = vld [vmem:[#allocation7 + $0xe0] sm:$0xff]  ;;  %v112_v37 = vld [vmem:[#allocation7 + $0xe8] sm:$0xff] }
  0x21   :  { %203 = vmatpush.msra.mxu2 %v121_v22  ;;  %223 = vmatpush.msra.mxu3 %v122_v23  ;;  %v105_v38 = vld [vmem:[#allocation7 + $0xb0] sm:$0xff]  ;;  %v106_v39 = vld [vmem:[#allocation7 + $0xb8] sm:$0xff]  ;;  %v107_v40 = vld [vmem:[#allocation7 + $0xc0] sm:$0xff] }
  0x22   :  { %182 = vmatpush.msra.mxu1 %v124_v25  ;;  %163 = vmatpush.msra.mxu0 %v119_v28  ;;  %v108_v41 = vld [vmem:[#allocation7 + $0xc8] sm:$0xff]  ;;  %v101_v42 = vld [vmem:[#allocation7 + $0x90] sm:$0xff]  ;;  %v102_v43 = vld [vmem:[#allocation7 + $0x98] sm:$0xff] }
  0x23   :  { %204 = vmatpush.msra.mxu2 %v117_v26  ;;  %224 = vmatpush.msra.mxu3 %v118_v27  ;;  %v103_v44 = vld [vmem:[#allocation7 + $0xa0] sm:$0xff]  ;;  %v104_v45 = vld [vmem:[#allocation7 + $0xa8] sm:$0xff]  ;;  %v97_v46 = vld [vmem:[#allocation7 + $0x70] sm:$0xff] }
  0x24   :  { %183 = vmatpush.msra.mxu1 %v120_v29  ;;  %164 = vmatpush.msra.mxu0 %v115_v32  ;;  %v98_v47 = vld [vmem:[#allocation7 + $0x78] sm:$0xff]  ;;  %v99_v48 = vld [vmem:[#allocation7 + $0x80] sm:$0xff]  ;;  %v100_v49 = vld [vmem:[#allocation7 + $0x88] sm:$0xff] }
  0x25   :  { %205 = vmatpush.msra.mxu2 %v113_v30  ;;  %225 = vmatpush.msra.mxu3 %v114_v31  ;;  %v93_v50 = vld [vmem:[#allocation7 + $0x50] sm:$0xff]  ;;  %v94_v51 = vld [vmem:[#allocation7 + $0x58] sm:$0xff]  ;;  %v95_v52 = vld [vmem:[#allocation7 + $0x60] sm:$0xff] }
  0x26   :  { %184 = vmatpush.msra.mxu1 %v116_v33  ;;  %165 = vmatpush.msra.mxu0 %v111_v36  ;;  %v96_v53 = vld [vmem:[#allocation7 + $0x68] sm:$0xff]  ;;  %v89_v54 = vld [vmem:[#allocation7 + $0x30] sm:$0xff]  ;;  %v90_v55 = vld [vmem:[#allocation7 + $0x38] sm:$0xff] }
  0x27   :  { %206 = vmatpush.msra.mxu2 %v109_v34  ;;  %226 = vmatpush.msra.mxu3 %v110_v35  ;;  %v91_v56 = vld [vmem:[#allocation7 + $0x40] sm:$0xff]  ;;  %v92_v57 = vld [vmem:[#allocation7 + $0x48] sm:$0xff]  ;;  %v85_v58 = vld [vmem:[#allocation7 + $0x10] sm:$0xff] }
  0x28   :  { %185 = vmatpush.msra.mxu1 %v112_v37  ;;  %166 = vmatpush.msra.mxu0 %v107_v40  ;;  %v86_v59 = vld [vmem:[#allocation7 + $0x18] sm:$0xff]  ;;  %v87_v61 = vld [vmem:[#allocation7 + $0x20] sm:$0xff]  ;;  %v88_v62 = vld [vmem:[#allocation7 + $0x28] sm:$0xff] }
  0x29   :  { %207 = vmatpush.msra.mxu2 %v105_v38  ;;  %227 = vmatpush.msra.mxu3 %v106_v39  ;;  %v82_v60 = vld [vmem:[#allocation4] sm:$0xf]  ;;  %v83_v1 = vld [vmem:[#allocation7] sm:$0xff]  ;;  %v84_v2 = vld [vmem:[#allocation7 + $0x8] sm:$0xff] }
  0x2a   :  { %186 = vmatpush.msra.mxu1 %v108_v41  ;;  %167 = vmatpush.msra.mxu0 %v103_v44  ;;  %v288_v63 = vld [vmem:[#allocation10 + $0x178] sm:$0xff]  ;;  %v287_v4 = vld [vmem:[#allocation10 + $0x170] sm:$0xff]  ;;  %v286_v8 = vld [vmem:[#allocation10 + $0x168] sm:$0xff] }
  0x2b   :  { %208 = vmatpush.msra.mxu2 %v101_v42  ;;  %228 = vmatpush.msra.mxu3 %v102_v43  ;;  %v304_v0 = vld [vmem:[#allocation10 + $0x1f8] sm:$0xff]  ;;  %v303_v6 = vld [vmem:[#allocation10 + $0x1f0] sm:$0xff]  ;;  %v302_v10 = vld [vmem:[#allocation10 + $0x1e8] sm:$0xff] }
  0x2c   :  { %187 = vmatpush.msra.mxu1 %v104_v45  ;;  %168 = vmatpush.msra.mxu0 %v99_v48  ;;  %v256_v3 = vld [vmem:[#allocation10 + $0x78] sm:$0xff]  ;;  %v255_v7 = vld [vmem:[#allocation10 + $0x70] sm:$0xff]  ;;  %v254_v11 = vld [vmem:[#allocation10 + $0x68] sm:$0xff] }
  0x2d   :  { %209 = vmatpush.msra.mxu2 %v97_v46  ;;  %229 = vmatpush.msra.mxu3 %v98_v47  ;;  %v272_v5 = vld [vmem:[#allocation10 + $0xf8] sm:$0xff]  ;;  %v271_v9 = vld [vmem:[#allocation10 + $0xf0] sm:$0xff]  ;;  %v285_v12 = vld [vmem:[#allocation10 + $0x160] sm:$0xff] }
  0x2e   :  { %188 = vmatpush.msra.mxu1 %v100_v49  ;;  %169 = vmatpush.msra.mxu0 %v95_v52  ;;  %v270_v13 = vld [vmem:[#allocation10 + $0xe8] sm:$0xff]  ;;  %v301_v14 = vld [vmem:[#allocation10 + $0x1e0] sm:$0xff]  ;;  %v284_v16 = vld [vmem:[#allocation10 + $0x158] sm:$0xff] }
  0x2f   :  { %210 = vmatpush.msra.mxu2 %v93_v50  ;;  %230 = vmatpush.msra.mxu3 %v94_v51  ;;  %v253_v15 = vld [vmem:[#allocation10 + $0x60] sm:$0xff]  ;;  %v300_v18 = vld [vmem:[#allocation10 + $0x1d8] sm:$0xff]  ;;  %v283_v20 = vld [vmem:[#allocation10 + $0x150] sm:$0xff] }
  0x30   :  { %189 = vmatpush.msra.mxu1 %v96_v53  ;;  %170 = vmatpush.msra.mxu0 %v91_v56  ;;  %v269_v17 = vld [vmem:[#allocation10 + $0xe0] sm:$0xff]  ;;  %v252_v19 = vld [vmem:[#allocation10 + $0x58] sm:$0xff]  ;;  %v299_v22 = vld [vmem:[#allocation10 + $0x1d0] sm:$0xff] }
  0x31   :  { %211 = vmatpush.msra.mxu2 %v89_v54  ;;  %231 = vmatpush.msra.mxu3 %v90_v55  ;;  %v268_v21 = vld [vmem:[#allocation10 + $0xd8] sm:$0xff]  ;;  %v251_v23 = vld [vmem:[#allocation10 + $0x50] sm:$0xff]  ;;  %v282_v24 = vld [vmem:[#allocation10 + $0x148] sm:$0xff] }
  0x32   :  { %190 = vmatpush.msra.mxu1 %v92_v57  ;;  %171 = vmatpush.msra.mxu0 %v87_v61  ;;  %v267_v25 = vld [vmem:[#allocation10 + $0xd0] sm:$0xff]  ;;  %v298_v26 = vld [vmem:[#allocation10 + $0x1c8] sm:$0xff]  ;;  %v281_v28 = vld [vmem:[#allocation10 + $0x140] sm:$0xff] }
  0x33   :  { %212 = vmatpush.msra.mxu2 %v85_v58  ;;  %232 = vmatpush.msra.mxu3 %v86_v59  ;;  %v250_v27 = vld [vmem:[#allocation10 + $0x48] sm:$0xff]  ;;  %v297_v30 = vld [vmem:[#allocation10 + $0x1c0] sm:$0xff]  ;;  %v280_v32 = vld [vmem:[#allocation10 + $0x138] sm:$0xff] }
  0x34   :  { %213 = vmatmul.f32.vlgmr.msra.gmra.mxu2 %v82_v60  ;;  %233 = vmatmul.f32.vlgmr.msra.gmra.mxu3 %v82_v60  ;;  %v266_v29 = vld [vmem:[#allocation10 + $0xc8] sm:$0xff]  ;;  %v249_v31 = vld [vmem:[#allocation10 + $0x40] sm:$0xff]  ;;  %v296_v34 = vld [vmem:[#allocation10 + $0x1b8] sm:$0xff] }
  0x35   :  { %191 = vmatpush.msra.mxu1 %v88_v62  ;;  %349 = vmatpush.msrb.mxu2 %v288_v63  ;;  %v265_v33 = vld [vmem:[#allocation10 + $0xc0] sm:$0xff]  ;;  %v248_v35 = vld [vmem:[#allocation10 + $0x38] sm:$0xff]  ;;  %v279_v36 = vld [vmem:[#allocation10 + $0x130] sm:$0xff] }
  0x36   :  { %369 = vmatpush.msrb.mxu3 %v304_v0  ;;  %172 = vmatpush.msra.mxu0 %v83_v1  ;;  %v264_v37 = vld [vmem:[#allocation10 + $0xb8] sm:$0xff]  ;;  %v295_v38 = vld [vmem:[#allocation10 + $0x1b0] sm:$0xff]  ;;  %v278_v40 = vld [vmem:[#allocation10 + $0x128] sm:$0xff] }
  0x37   :  { %192 = vmatpush.msra.mxu1 %v84_v2  ;;  %173 = vmatmul.f32.vlgmr.msra.gmra.mxu0 %v82_v60  ;;  %v247_v39 = vld [vmem:[#allocation10 + $0x30] sm:$0xff]  ;;  %v294_v42 = vld [vmem:[#allocation10 + $0x1a8] sm:$0xff]  ;;  %v277_v44 = vld [vmem:[#allocation10 + $0x120] sm:$0xff] }
  0x38   :  { %193 = vmatmul.f32.vlgmr.msra.gmra.mxu1 %v82_v60  ;;  %309 = vmatpush.msrb.mxu0 %v256_v3  ;;  %v263_v41 = vld [vmem:[#allocation10 + $0xb0] sm:$0xff]  ;;  %v246_v43 = vld [vmem:[#allocation10 + $0x28] sm:$0xff]  ;;  %v293_v46 = vld [vmem:[#allocation10 + $0x1a0] sm:$0xff] }
  0x39   :  { %350 = vmatpush.msrb.mxu2 %v287_v4  ;;  %329 = vmatpush.msrb.mxu1 %v272_v5  ;;  %v262_v45 = vld [vmem:[#allocation10 + $0xa8] sm:$0xff]  ;;  %v245_v47 = vld [vmem:[#allocation10 + $0x20] sm:$0xff]  ;;  %v276_v48 = vld [vmem:[#allocation10 + $0x118] sm:$0xff] }
  0x3a   :  { %370 = vmatpush.msrb.mxu3 %v303_v6  ;;  %310 = vmatpush.msrb.mxu0 %v255_v7  ;;  %v244_v49 = vld [vmem:[#allocation10 + $0x18] sm:$0xff]  ;;  %v261_v50 = vld [vmem:[#allocation10 + $0xa0] sm:$0xff]  ;;  %v275_v51 = vld [vmem:[#allocation10 + $0x110] sm:$0xff] }
  0x3b   :  { %351 = vmatpush.msrb.mxu2 %v286_v8  ;;  %330 = vmatpush.msrb.mxu1 %v271_v9  ;;  %v292_v52 = vld [vmem:[#allocation10 + $0x198] sm:$0xff]  ;;  %v243_v53 = vld [vmem:[#allocation10 + $0x10] sm:$0xff]  ;;  %v274_v55 = vld [vmem:[#allocation10 + $0x108] sm:$0xff] }
  0x3c   :  { %371 = vmatpush.msrb.mxu3 %v302_v10  ;;  %311 = vmatpush.msrb.mxu0 %v254_v11  ;;  %v260_v54 = vld [vmem:[#allocation10 + $0x98] sm:$0xff]  ;;  %v291_v56 = vld [vmem:[#allocation10 + $0x190] sm:$0xff]  ;;  %v242_v57 = vld [vmem:[#allocation10 + $0x8] sm:$0xff] }
  0x3d   :  { %352 = vmatpush.msrb.mxu2 %v285_v12  ;;  %331 = vmatpush.msrb.mxu1 %v270_v13  ;;  %v259_v58 = vld [vmem:[#allocation10 + $0x90] sm:$0xff]  ;;  %v273_v59 = vld [vmem:[#allocation10 + $0x100] sm:$0xff]  ;;  %v290_v60 = vld [vmem:[#allocation10 + $0x188] sm:$0xff] }
  0x3e   :  { %372 = vmatpush.msrb.mxu3 %v301_v14  ;;  %312 = vmatpush.msrb.mxu0 %v253_v15  ;;  %v241_v61 = vld [vmem:[#allocation10] sm:$0xff]  ;;  %v258_v62 = vld [vmem:[#allocation10 + $0x88] sm:$0xff]  ;;  %v147_v1 = vld [vmem:[#allocation9] sm:$0xf] }
  0x3f   :  { %353 = vmatpush.msrb.mxu2 %v284_v16  ;;  %332 = vmatpush.msrb.mxu1 %v269_v17  ;;  %v289_v63 = vld [vmem:[#allocation10 + $0x180] sm:$0xff]  ;;  %v149_v2 = vperm.slane %v147_v1, 0  ;;  %v150_v3 = vperm.slane %v147_v1, 1  ;;  %v151_v4 = vperm.slane %v147_v1, 2  ;;  %v152_v5 = vperm.slane %v147_v1, 3 }
  0x40   :  { %373 = vmatpush.msrb.mxu3 %v300_v18  ;;  %313 = vmatpush.msrb.mxu0 %v252_v19  ;;  %v257_v0 = vld [vmem:[#allocation10 + $0x80] sm:$0xff]  ;;  %v418_v18 = vld [vmem:[%s614_s5] ss:$0 sm:$0xff] }
  0x41   :  { %354 = vmatpush.msrb.mxu2 %v283_v20  ;;  %333 = vmatpush.msrb.mxu1 %v268_v21 }
  0x42   :  { %374 = vmatpush.msrb.mxu3 %v299_v22  ;;  %314 = vmatpush.msrb.mxu0 %v251_v23 }
  0x43   :  { %355 = vmatpush.msrb.mxu2 %v282_v24  ;;  %334 = vmatpush.msrb.mxu1 %v267_v25 }
  0x44   :  { %375 = vmatpush.msrb.mxu3 %v298_v26  ;;  %315 = vmatpush.msrb.mxu0 %v250_v27 }
  0x45   :  { %356 = vmatpush.msrb.mxu2 %v281_v28  ;;  %335 = vmatpush.msrb.mxu1 %v266_v29 }
  0x46   :  { %376 = vmatpush.msrb.mxu3 %v297_v30  ;;  %316 = vmatpush.msrb.mxu0 %v249_v31 }
  0x47   :  { %357 = vmatpush.msrb.mxu2 %v280_v32  ;;  %336 = vmatpush.msrb.mxu1 %v265_v33 }
  0x48   :  { %377 = vmatpush.msrb.mxu3 %v296_v34  ;;  %317 = vmatpush.msrb.mxu0 %v248_v35 }
  0x49   :  { %358 = vmatpush.msrb.mxu2 %v279_v36  ;;  %337 = vmatpush.msrb.mxu1 %v264_v37 }
  0x4a   :  { %378 = vmatpush.msrb.mxu3 %v295_v38  ;;  %318 = vmatpush.msrb.mxu0 %v247_v39 }
  0x4b   :  { %359 = vmatpush.msrb.mxu2 %v278_v40  ;;  %338 = vmatpush.msrb.mxu1 %v263_v41 }
  0x4c   :  { %379 = vmatpush.msrb.mxu3 %v294_v42  ;;  %319 = vmatpush.msrb.mxu0 %v246_v43 }
  0x4d   :  { %360 = vmatpush.msrb.mxu2 %v277_v44  ;;  %339 = vmatpush.msrb.mxu1 %v262_v45 }
  0x4e   :  { %380 = vmatpush.msrb.mxu3 %v293_v46  ;;  %320 = vmatpush.msrb.mxu0 %v245_v47 }
  0x4f   :  { %361 = vmatpush.msrb.mxu2 %v276_v48  ;;  %340 = vmatpush.msrb.mxu1 %v261_v50 }
  0x50   :  { %321 = vmatpush.msrb.mxu0 %v244_v49  ;;  %381 = vmatpush.msrb.mxu3 %v292_v52 }
  0x51   :  { %362 = vmatpush.msrb.mxu2 %v275_v51  ;;  %341 = vmatpush.msrb.mxu1 %v260_v54 }
  0x52   :  { %322 = vmatpush.msrb.mxu0 %v243_v53  ;;  %382 = vmatpush.msrb.mxu3 %v291_v56 }
  0x53   :  { %363 = vmatpush.msrb.mxu2 %v274_v55  ;;  %342 = vmatpush.msrb.mxu1 %v259_v58 }
  0x54   :  { %323 = vmatpush.msrb.mxu0 %v242_v57  ;;  %383 = vmatpush.msrb.mxu3 %v290_v60 }
  0x55   :  { %364 = vmatpush.msrb.mxu2 %v273_v59  ;;  %343 = vmatpush.msrb.mxu1 %v258_v62 }
  0x56   :  { %324 = vmatpush.msrb.mxu0 %v241_v61  ;;  %384 = vmatpush.msrb.mxu3 %v289_v63 }
  0x57   :  { %344 = vmatpush.msrb.mxu1 %v257_v0 }
  0xb4   :  { %v174_v6 = vpop.f32.mrf.mxu0 }
  0xb5   :  { %v194_v7 = vpop.f32.mrf.mxu1  ;;  %v175_v8 = vadd.f32 %v174_v6, %v149_v2 }
  0xb6   :  { %v195_v9 = vadd.f32 %v194_v7, %v150_v3 }
  0xb7   :  { %v214_v10 = vpop.f32.mrf.mxu2  ;;  %v234_v11 = vpop.f32.mrf.mxu3  ;;  %v237_v13 = vmax.f32 %v175_v8, 0.0 }
  0xb8   :  { %v215_v12 = vadd.f32 %v214_v10, %v151_v4  ;;  %v235_v14 = vadd.f32 %v234_v11, %v152_v5  ;;  %v238_v15 = vmax.f32 %v195_v9, 0.0 }
  0xb9   :  { %325 = vmatmul.f32.vlgmr.msrb.gmra.mxu0 %v237_v13 }
  0xba   :  { %v239_v16 = vmax.f32 %v215_v12, 0.0  ;;  %v240_v17 = vmax.f32 %v235_v14, 0.0  ;;  %345 = vmatmul.f32.vlgmr.msrb.gmra.mxu1 %v238_v15 }
  0xbc   :  { %365 = vmatmul.f32.vlgmr.msrb.gmra.mxu2 %v239_v16  ;;  %385 = vmatmul.f32.vlgmr.msrb.gmra.mxu3 %v240_v17 }
 0x136   :  { %v326_v19 = vpop.f32.mrf.mxu0 }
 0x137   :  { %v327_v20 = vadd.f32 %v418_v18, %v326_v19  ;;  %v346_v21 = vpop.f32.mrf.mxu1 }
 0x139   :  { %v347_v22 = vadd.f32 %v346_v21, %v327_v20 }
 0x13f   :  { %v366_v23 = vpop.f32.mrf.mxu2  ;;  %v386_v24 = vpop.f32.mrf.mxu3 }
 0x140   :  { %v367_v25 = vadd.f32 %v366_v23, %v347_v22 }
 0x142   :  { %v387_v26 = vadd.f32 %v386_v24, %v367_v25 }
 0x144   :  { %389 = vst [vmem:[#allocation12] sm:$0xf] %v387_v26 }
 0x145   :  { %400 = dma.vmem_to_hbm [thread:$0]  %s396_s19, 64, %s398_s21, [#allocation6]  }
 0x146   :  { %545 = dma.done.wait [#allocation6], 64  }
 0x147   :  { %546 = vsyncadd [#allocation6], 4294967232 }
 0x148   :  { %405 = vsyncpa [#allocation5], 1 }
 0x149   :  { %406 = vsyncpa [#allocation8], 1 }
 0x14a   :  { %407 = vsyncpa [#allocation11], 1 }
 0x14b   :  { %408 = vsyncpa [#allocation6], 1 }

</bundles_post_ra>
